<compile_context>
chip_gen: v7x
topology: tpu7x:2x2x1
jax: 0.10.0
libtpu: 0.0.40
codegen_flags: <defaults>
</compile_context>

<pallas_src>
import functools

import jax
import jax.numpy as jnp
from jax import lax
from jax.experimental import pallas as pl
from jax.experimental.pallas import tpu as pltpu


def _cdiv(a, b):
    return -(-a // b)


def _round_up(x, m):
    return ((x + m - 1) // m) * m


def _tpu_hw():
    """Returns (vmem_capacity_bytes, tensorcores_per_chip) with safe fallbacks."""
    vmem_cap = 128 * 1024 * 1024
    try:
        info = pltpu.get_tpu_info()
        vmem_cap = int(getattr(info, "vmem_capacity_bytes", vmem_cap))
    except Exception:
        pass
    # 64 MiB VMEM per TensorCore => v7x-style chip with 2 TCs; v5e/v6e => 1 TC.
    cores = 2 if vmem_cap <= 64 * 1024 * 1024 else 1
    return vmem_cap, cores


def _fused_gate_mul_kernel(rh_ref, w_ref, b_ref, x_ref, o_ref, *, rh_dim):
    # rh_ref: (tb, 1, rh_dim); w_ref: (1, C) if rh_dim == 1 else (C, rh_dim);
    # b_ref: (1, C); x_ref / o_ref: (tb, C, thw).
    rh = rh_ref[...].astype(jnp.float32)[:, 0, :]            # (tb, rh_dim)
    w = w_ref[...].astype(jnp.float32)
    b = b_ref[...].astype(jnp.float32)
    if rh_dim == 1:
        # Size-1 contraction: pure VPU outer product, no MXU involvement.
        g = rh * w + b                                        # (tb,1)*(1,C)+(1,C)
    else:
        # PyTorch nn.Linear layout (C, rh_dim): transposed contraction on the MXU,
        # no materialized weight.T in the wrapper.
        g = lax.dot_general(rh, w, (((1,), (1,)), ((), ())),
                            preferred_element_type=jnp.float32) + b
    g = jax.nn.sigmoid(g)                                     # (tb, C) f32
    # Multiply in f32; cast only at the store (free under the memory bound and
    # matches the f32 gate of the PyTorch reference).
    x = x_ref[...].astype(jnp.float32)                        # (tb, C, thw)
    o_ref[...] = (x * g[:, :, None]).astype(o_ref.dtype)


def gating_with_rh(aux_output, rh, weight, bias, *,
                   target_block_bytes=None, donate_aux=False):
    """aux_output: (B, C, H, W); rh: (B, rh_dim);
    weight: (C, rh_dim) [PyTorch nn.Linear layout]; bias: (C,)."""
    B, C, H, W = aux_output.shape
    rh_dim = rh.shape[-1]
    HW = H * W
    itemsize = jnp.dtype(aux_output.dtype).itemsize
    rh_item = jnp.dtype(rh.dtype).itemsize
    w_item = jnp.dtype(weight.dtype).itemsize
    b_item = jnp.dtype(bias.dtype).itemsize
    sublane = max(8, 32 // max(1, itemsize))       # f32: 8, bf16: 16, int8: 32

    vmem_cap, n_cores = _tpu_hw()
    vmem_budget = max(32 * 1024 * 1024, vmem_cap - 16 * 1024 * 1024)
    if target_block_bytes is None:
        # BW-bound multiply: big blocks amortize the ~0.35us/step overhead.
        target_block_bytes = (6 * 1024 * 1024 if vmem_cap <= 64 * 1024 * 1024
                              else 12 * 1024 * 1024)

    # ---- tile selection -------------------------------------------------
    bytes_per_batch = C * HW * itemsize
    if bytes_per_batch <= target_block_bytes:
        # Pack several batch elements per block, keep full (C, HW) per element.
        tb = max(1, min(B, target_block_bytes // max(1, bytes_per_batch)))
        thw = HW
    else:
        # Tile the HW (lane) axis with a 128-multiple chunk near the target;
        # cdiv grid below masks the edge block for awkward HW.
        tb = 1
        lanes = 128 * max(1, target_block_bytes // max(1, C * itemsize * 128))
        thw = HW if lanes >= HW else lanes

    # Megacore (v7x): guarantee >= 2 grid steps once traffic is non-trivial.
    total_bytes = B * bytes_per_batch
    if (n_cores >= 2 and total_bytes >= 4 * 1024 * 1024
            and _cdiv(B, tb) * _cdiv(HW, thw) < 2):
        if B >= 2:
            tb = _cdiv(B, 2)
        elif HW > 128:
            thw = _round_up(_cdiv(HW, 2), 128)
    # (v5e/v6e: single TC -> never split a block that already fits.)

    # ---- VMEM accounting (with lane/sublane padding) and clamping -------
    if rh_dim == 1:
        w_pad = 8 * _round_up(C, 128) * w_item
    else:
        w_pad = _round_up(C, 8) * _round_up(rh_dim, 128) * w_item
    b_pad = 8 * _round_up(C, 128) * b_item
    rh_sub = max(8, 32 // max(1, rh_item))

    def vmem_need(tb_, thw_):
        blk = tb_ * _round_up(C, sublane) * _round_up(thw_, 128) * itemsize
        rh_blk = tb_ * rh_sub * _round_up(rh_dim, 128) * rh_item
        # aux in + out double-buffered, rh double-buffered, params resident (x2).
        return 4 * blk + 2 * rh_blk + 2 * (w_pad + b_pad) + (1 << 20)

    while vmem_need(tb, thw) > vmem_budget:
        if thw > 128 and HW > 128:
            new = _round_up(max(128, thw // 2), 128)
            thw = 128 if new >= thw else new
        elif tb > 1:
            tb = max(1, tb // 2)
        else:
            break
    vmem_limit = int(min(vmem_budget, max(2 * vmem_need(tb, thw),
                                          32 * 1024 * 1024)))

    grid = (_cdiv(B, tb), _cdiv(HW, thw))

    # ---- reshapes (bitcast-level, no data movement) ----------------------
    x = aux_output.reshape(B, C, HW)               # flattened spatial -> lanes
    rh3 = rh.reshape(B, 1, rh_dim)                 # keeps tb free of the (8,128) rule
    b2 = bias.reshape(1, C)
    w_in = weight.reshape(1, C) if rh_dim == 1 else weight

    kernel = functools.partial(_fused_gate_mul_kernel, rh_dim=rh_dim)

    out = pl.pallas_call(
        kernel,
        out_shape=jax.ShapeDtypeStruct((B, C, HW), aux_output.dtype),
        grid_spec=pltpu.PrefetchScalarGridSpec(
            num_scalar_prefetch=0,
            grid=grid,
            in_specs=[
                pl.BlockSpec((tb, 1, rh_dim), lambda ib, ij: (ib, 0, 0)),  # rh
                pl.BlockSpec(w_in.shape, lambda ib, ij: (0, 0)),           # weight
                pl.BlockSpec((1, C), lambda ib, ij: (0, 0)),               # bias
                pl.BlockSpec((tb, C, thw), lambda ib, ij: (ib, 0, ij)),    # aux
            ],
            out_specs=pl.BlockSpec((tb, C, thw), lambda ib, ij: (ib, 0, ij)),
        ),
        compiler_params=pltpu.CompilerParams(
            dimension_semantics=("parallel", "parallel"),
            vmem_limit_bytes=vmem_limit),
        cost_estimate=pl.CostEstimate(
            flops=2 * B * C * HW + 2 * B * rh_dim * C * grid[1],
            transcendentals=B * C * grid[1],
            bytes_accessed=2 * B * C * HW * itemsize
                           + B * rh_dim * rh_item + C * (rh_dim + 1) * 4),
        # Reuse the aux buffer for the output when the caller can donate it
        # (halves HBM capacity pressure; most valuable on v5e's 16 GiB HBM).
        input_output_aliases=({3: 0} if donate_aux else {}),
    )(rh3, w_in, b2, x)

    return out.reshape(B, C, H, W)


if __name__ == "__main__":
    # Small shapes consistent with the module (feature_dim == channel dim of aux).
    B, C, H, W = 2, 32, 16, 16
    rh_dim = 1

    key = jax.random.PRNGKey(0)
    k1, k2, k3, k4 = jax.random.split(key, 4)

    aux_output = jax.random.normal(k1, (B, C, H, W), dtype=jnp.float32)
    rh = jax.random.normal(k2, (B, rh_dim), dtype=jnp.float32)
    # Deterministic Linear(rh_dim, feature_dim) params (PyTorch layout: (C, rh_dim)).
    weight = jax.random.normal(k3, (C, rh_dim), dtype=jnp.float32) * 0.1
    bias = jax.random.normal(k4, (C,), dtype=jnp.float32) * 0.1

    out = gating_with_rh(aux_output, rh, weight, bias)
    out = jax.block_until_ready(out)

    # Pure-JAX reference check.
    gate_ref = jax.nn.sigmoid(rh @ weight.T + bias)          # (B, C)
    ref = aux_output * gate_ref[:, :, None, None]
    assert out.shape == aux_output.shape
    assert jnp.allclose(out, ref, atol=1e-5, rtol=1e-5)

    print("KERNEL_OK")
</pallas_src>

<mosaic_0001>
module attributes {stable_mosaic.version = 11 : i64} {
  func.func @_fused_gate_mul_kernel(%arg0: i32, %arg1: i32, %arg2: memref<2x1x1xf32, #tpu.memory_space<vmem>>, %arg3: memref<1x32xf32, #tpu.memory_space<vmem>>, %arg4: memref<1x32xf32, #tpu.memory_space<vmem>>, %arg5: memref<2x32x256xf32, #tpu.memory_space<vmem>>, %arg6: memref<2x32x256xf32, #tpu.memory_space<vmem>>) attributes {dimension_semantics = [#tpu.dimension_semantics<parallel>, #tpu.dimension_semantics<parallel>], iteration_bounds = array<i64: 1, 1>, scalar_prefetch = 0 : i64, scratch_operands = 0 : i64, tpu.core_type = #tpu.core_type<tc>, window_params = [{transform_indices = @transform_0, window_bounds = array<i64: 2, 1, 1>}, {pipeline_mode = #tpu.pipeline_mode<synchronous>, transform_indices = @transform_1, window_bounds = array<i64: 1, 32>}, {pipeline_mode = #tpu.pipeline_mode<synchronous>, transform_indices = @transform_2, window_bounds = array<i64: 1, 32>}, {transform_indices = @transform_3, window_bounds = array<i64: 2, 32, 256>}, {transform_indices = @transform_4, window_bounds = array<i64: 2, 32, 256>}]} {
    %c0 = arith.constant 0 : index
    %c0_0 = arith.constant 0 : index
    %c0_1 = arith.constant 0 : index
    %0 = vector.load %arg2[%c0, %c0_0, %c0_1] : memref<2x1x1xf32, #tpu.memory_space<vmem>>, vector<2x1x1xf32>
    %1 = vector.shape_cast %0 : vector<2x1x1xf32> to vector<2x1xf32>
    %c0_2 = arith.constant 0 : index
    %c0_3 = arith.constant 0 : index
    %2 = vector.load %arg3[%c0_2, %c0_3] : memref<1x32xf32, #tpu.memory_space<vmem>>, vector<1x32xf32>
    %c0_4 = arith.constant 0 : index
    %c0_5 = arith.constant 0 : index
    %3 = vector.load %arg4[%c0_4, %c0_5] : memref<1x32xf32, #tpu.memory_space<vmem>>, vector<1x32xf32>
    %4 = vector.broadcast %1 : vector<2x1xf32> to vector<2x32xf32>
    %5 = vector.broadcast %2 : vector<1x32xf32> to vector<2x32xf32>
    %6 = arith.mulf %4, %5 : vector<2x32xf32>
    %7 = vector.broadcast %3 : vector<1x32xf32> to vector<2x32xf32>
    %8 = arith.addf %6, %7 : vector<2x32xf32>
    %9 = arith.negf %8 : vector<2x32xf32>
    %10 = math.exp %9 : vector<2x32xf32>
    %cst = arith.constant 1.000000e+00 : f32
    %11 = vector.broadcast %cst : f32 to vector<2x32xf32>
    %12 = arith.addf %11, %10 : vector<2x32xf32>
    %13 = arith.divf %11, %12 : vector<2x32xf32>
    %c0_6 = arith.constant 0 : index
    %c0_7 = arith.constant 0 : index
    %c0_8 = arith.constant 0 : index
    %14 = vector.load %arg5[%c0_6, %c0_7, %c0_8] : memref<2x32x256xf32, #tpu.memory_space<vmem>>, vector<2x32x256xf32>
    %15 = vector.shape_cast %13 : vector<2x32xf32> to vector<2x32x1xf32>
    %16 = vector.broadcast %15 : vector<2x32x1xf32> to vector<2x32x256xf32>
    %17 = arith.mulf %14, %16 : vector<2x32x256xf32>
    %c0_9 = arith.constant 0 : index
    %c0_10 = arith.constant 0 : index
    %c0_11 = arith.constant 0 : index
    %18 = vector.load %arg6[%c0_9, %c0_10, %c0_11] : memref<2x32x256xf32, #tpu.memory_space<vmem>>, vector<2x32x256xf32>
    tpu.vector_store %arg6[%c0_9, %c0_10, %c0_11], %17 {strides = array<i32>} : memref<2x32x256xf32, #tpu.memory_space<vmem>>, vector<2x32x256xf32>,
    return
  }
  func.func @transform_0(%arg0: i32, %arg1: i32) -> (i32, i32, i32) {
    %c0_i32 = arith.constant 0 : i32
    %c0_i32_0 = arith.constant 0 : i32
    %c0_i32_1 = arith.constant 0 : i32
    return %arg0, %c0_i32, %c0_i32_0 : i32, i32, i32
  }
  func.func @transform_1(%arg0: i32, %arg1: i32) -> (i32, i32) {
    %c0_i32 = arith.constant 0 : i32
    %c0_i32_0 = arith.constant 0 : i32
    %c0_i32_1 = arith.constant 0 : i32
    return %c0_i32, %c0_i32_0 : i32, i32
  }
  func.func @transform_2(%arg0: i32, %arg1: i32) -> (i32, i32) {
    %c0_i32 = arith.constant 0 : i32
    %c0_i32_0 = arith.constant 0 : i32
    %c0_i32_1 = arith.constant 0 : i32
    return %c0_i32, %c0_i32_0 : i32, i32
  }
  func.func @transform_3(%arg0: i32, %arg1: i32) -> (i32, i32, i32) {
    %c0_i32 = arith.constant 0 : i32
    %c0_i32_0 = arith.constant 0 : i32
    return %arg0, %c0_i32, %arg1 : i32, i32, i32
  }
  func.func @transform_4(%arg0: i32, %arg1: i32) -> (i32, i32, i32) {
    %c0_i32 = arith.constant 0 : i32
    %c0_i32_0 = arith.constant 0 : i32
    return %arg0, %c0_i32, %arg1 : i32, i32, i32
  }
}

</mosaic_0001>

<bundles_post_ra>
// kernel: tpu_custom_call.1
= control target key start
LH: loop header
LB: loop body
LE: loop exit
PB: predicated region body
PF: predicated region fallthrough
CT: control target
= control target key end

     0   :  { %9 = vsyncpa [#allocation3], 0  ;;  %s389_s0 = inlined_call_operand.vmem [shape: f32[2,1,1], index: 0, kind: input, shape index: {}]   ;;  %s390_s1 = inlined_call_operand.vmem [shape: f32[1,32], index: 1, kind: input, shape index: {}]   ;;  %s391_s2 = inlined_call_operand.vmem [shape: f32[1,32], index: 2, kind: input, shape index: {}]   ;;  %s392_s3 = inlined_call_operand.hbm [shape: f32[2,32,256], index: 3, kind: input, shape index: {}]   ;;  %s393_s4 = inlined_call_operand.hbm [shape: f32[2,32,256], index: 4, kind: output, shape index: {}]  }
   0x1   :  { %10 = vsyncpa [#allocation4], 0  ;;  %s316_s15 = smov [#allocation2]   ;;  %s268_s19 = scalar_lea.hbm %s392_s3, 2048 }
   0x2   :  { %s22_s16 = sshll.u32 %s316_s15, 4  ;;  %p269_p0 = scmp.ne.s32.totalorder %s392_s3, %s268_s19  ;;  %s23_s16 = int_to_ptr.vmem [resolvable:$true] %s22_s16 }
   0x3   :  { %p272_p1 = scmp.lt.u32.totalorder %s268_s19, %s392_s3 }
   0x5   :  { %p274_p2 = pnand %p272_p1, %p269_p0 }
   0x7   :  { %277 = shalt.err (!%p274_p2)
}
   0x8   :  { %s278_s24 = scalar_lea.vmem %s23_s16, 2048  ;;  %p283_p4 = scmp.lt.s32.totalorder %s23_s16, %s23_s16 }
   0x9   :  { %p279_p3 = scmp.ne.s32.totalorder %s23_s16, %s278_s24  ;;  %p284_p5 = scmp.lt.s32.totalorder %s278_s24, %s278_s24 }
   0xb   :  { %p285_p6 = por %p284_p5, %p283_p4 }
   0xd   :  { %p286_p7 = pnand %p285_p6, %p279_p3 }
   0xf   :  { %289 = shalt.err (!%p286_p7)
}
  0x10   :  { %s317_s25 = smov 256   ;;  %s318_s26 = smov 16  }
  0x11   :  { %28 = dma.hbm_to_vmem [thread:$0]  %s392_s3, 2048, %s23_s16, [#allocation3], %s317_s25, %s317_s25, %s318_s26  }
  0x12   :  { %312 = dma.done.wait [#allocation3], 2048  }
  0x13   :  { %313 = vsyncadd [#allocation3], 4294965248  ;;  %v319_v0 = vmov 0   ;;  %v32_v1 = vld [vmem:[%s389_s0] sm:$0x1]  ;;  %v41_v3 = vlaneseq  ;;  %v132_v42 = vld [vmem:[#allocation2 + $0x20] sm:$0xff] }
  0x14   :  { %259 = vset.pattern.permute.xlu0 %v319_v0  ;;  %v33_v2 = vld [vmem:[%s389_s0 + $0x1] sm:$0x1]  ;;  %v320_v4 = vmov 1966171168   ;;  %v249_v9 = vld [vmem:[%s390_s1] ss:$0 sm:$0xff] }
  0x15   :  { %38 = vperm.xlu0 %259, %v32_v1   ;;  %v60_v5 = vunpack.c.l.s4 %v320_v4  ;;  %v42_v6 = vshrl.u32 %v41_v3, 7  ;;  %v250_v10 = vld [vmem:[%s391_s2] ss:$0 sm:$0xff]  ;;  %v128_v44 = vld [vmem:[#allocation2] sm:$0xff]  ;;  %v130_v54 = vld [vmem:[#allocation2 + $0x10] sm:$0xff]  ;;  %s321_s0 = smov [#allocation5]  }
  0x16   :  { %v133_v43 = vld [vmem:[#allocation2 + $0x28] sm:$0xff]  ;;  %v136_v52 = vld [vmem:[#allocation2 + $0x40] sm:$0xff]  ;;  %v131_v55 = vld [vmem:[#allocation2 + $0x18] sm:$0xff]  ;;  %s237_s1 = sshll.u32 %s321_s0, 4  ;;  %s238_s1 = int_to_ptr.vmem [resolvable:$true] %s237_s1 }
  0x17   :  { %v61_v7 = vunpack.c.0.s8 %v60_v5  ;;  %v43_v12 = vsub.s32 0, %v42_v6  ;;  %v183_v40 = vsub.s32 1, %v42_v6  ;;  %v129_v45 = vld [vmem:[#allocation2 + $0x8] sm:$0xff]  ;;  %v140_v62 = vld [vmem:[#allocation2 + $0x60] sm:$0xff]  ;;  %v134_v0 = vld [vmem:[#allocation2 + $0x30] sm:$0xff]  ;;  %s290_s2 = scalar_lea.vmem %s238_s1, 2048  ;;  %p295_p9 = scmp.lt.s32.totalorder %s238_s1, %s238_s1 }
  0x18   :  { %v137_v53 = vld [vmem:[#allocation2 + $0x48] sm:$0xff]  ;;  %v135_v1 = vld [vmem:[#allocation2 + $0x38] sm:$0xff]  ;;  %p291_p8 = scmp.ne.s32.totalorder %s238_s1, %s290_s2  ;;  %p296_p10 = scmp.lt.s32.totalorder %s290_s2, %s290_s2 }
  0x19   :  { %47 = vperm.xlu0 %259, %v33_v2   ;;  %v64_v8 = vsub.s32 %v61_v7, %v42_v6  ;;  %v141_v63 = vld [vmem:[#allocation2 + $0x68] sm:$0xff] }
  0x1a   :  { %p297_p11 = por %p296_p10, %p295_p9 }
  0x1b   :  { %v65_v11 = vrot.slane %v249_v9, %v64_v8  ;;  %v96_v13 = vrot.slane %v250_v10, %v64_v8  ;;  %v139_v9 = vld [vmem:[#allocation2 + $0x58] sm:$0xff] }
  0x1c   :  { %p298_p12 = pnand %p297_p11, %p291_p8 }
  0x1d   :  { %v73_v14 = vrot.slane %v65_v11, %v64_v8  ;;  %v66_v15 = vcombine.high %v65_v11, %v65_v11  ;;  %v104_v17 = vrot.slane %v96_v13, %v64_v8  ;;  %v97_v19 = vcombine.high %v96_v13, %v96_v13  ;;  %v142_v13 = vld [vmem:[#allocation2 + $0x70] sm:$0xff] }
  0x1f   :  { %v80_v21 = vrot.slane %v66_v15, %v64_v8  ;;  %v111_v24 = vrot.slane %v97_v19, %v64_v8 }
  0x94   :  { %v39_v16 = vpop.permute.xlu0 %38 }
  0x95   :  { %v44_v18 = vrot.slane %v39_v16, %v43_v12 }
  0x97   :  { %v83_v20 = vmul.f32 %v73_v14, %v44_v18  ;;  %v143_v14 = vld [vmem:[#allocation2 + $0x78] sm:$0xff] }
  0x98   :  { %v48_v22 = vpop.permute.xlu0 %47 }
  0x99   :  { %v114_v23 = vadd.f32 %v104_v17, %v83_v20  ;;  %v53_v25 = vrot.slane %v48_v22, %v43_v12 }
  0x9b   :  { %v251_v26 = vmul.f32 -1.442695, %v114_v23  ;;  %v84_v27 = vmul.f32 %v80_v21, %v53_v25 }
  0x9d   :  { %260 = vpow2.f32 %v251_v26  ;;  %v115_v28 = vadd.f32 %v111_v24, %v84_v27 }
  0x9f   :  { %v252_v29 = vmul.f32 -1.442695, %v115_v28 }
  0xa1   :  { %262 = vpow2.f32 %v252_v29 }
  0xa7   :  { %v261_v30 = vpop.eup %260 }
  0xa8   :  { %v122_v31 = vadd.f32 1.0, %v261_v30 }
  0xaa   :  { %264 = vrcp.f32 %v122_v31 }
  0xab   :  { %v263_v32 = vpop.eup %262 }
  0xac   :  { %v123_v33 = vadd.f32 1.0, %v263_v32 }
  0xae   :  { %266 = vrcp.f32 %v123_v33 }
  0xb4   :  { %v265_v34 = vpop.eup %264 }
  0xb8   :  { %v267_v35 = vpop.eup %266 }
  0xb9   :  { %v146_v36 = vcombine.low %v265_v34, %v267_v35 }
  0xbb   :  { %v153_v37 = vrot.slane %v146_v36, %v64_v8 }
  0xbd   :  { %v160_v38 = vrot.slane %v153_v37, %v64_v8  ;;  %v138_v8 = vld [vmem:[#allocation2 + $0x50] sm:$0xff] }
  0xbf   :  { %v165_v39 = vrot.slane %v160_v38, %v43_v12  ;;  %v184_v41 = vrot.slane %v160_v38, %v183_v40 }
  0xc1   :  { %175 = vbcast.lane.b32.xlu0 %v165_v39, 272  ;;  %167 = vbcast.lane.b32.xlu1 %v165_v39, 256 }
  0xc5   :  { %186 = vbcast.lane.b32.xlu0 %v184_v41, 256  ;;  %171 = vbcast.lane.b32.xlu1 %v165_v39, 264 }
  0xc9   :  { %194 = vbcast.lane.b32.xlu0 %v184_v41, 272  ;;  %179 = vbcast.lane.b32.xlu1 %v165_v39, 280 }
  0xcd   :  { %190 = vbcast.lane.b32.xlu1 %v184_v41, 264 }
  0xd1   :  { %198 = vbcast.lane.b32.xlu1 %v184_v41, 280 }
 0x133   :  { %v176_v46 = vpop.permute.xlu0 %175  ;;  %v168_v47 = vpop.permute.xlu1 %167 }
 0x134   :  { %v204_v48 = vmul.f32 %v176_v46, %v132_v42  ;;  %v205_v49 = vmul.f32 %v176_v46, %v133_v43  ;;  %v200_v50 = vmul.f32 %v168_v47, %v128_v44  ;;  %v201_v51 = vmul.f32 %v168_v47, %v129_v45 }
 0x136   :  { %220 = vst [vmem:[#allocation5 + $0x20] sm:$0xff] %v204_v48  ;;  %221 = vst [vmem:[#allocation5 + $0x28] sm:$0xff] %v205_v49 }
 0x137   :  { %216 = vst [vmem:[#allocation5] sm:$0xff] %v200_v50  ;;  %217 = vst [vmem:[#allocation5 + $0x8] sm:$0xff] %v201_v51  ;;  %v187_v56 = vpop.permute.xlu0 %186  ;;  %v172_v57 = vpop.permute.xlu1 %171 }
 0x138   :  { %v208_v58 = vmul.f32 %v187_v56, %v136_v52  ;;  %v209_v59 = vmul.f32 %v187_v56, %v137_v53  ;;  %v202_v60 = vmul.f32 %v172_v57, %v130_v54  ;;  %v203_v61 = vmul.f32 %v172_v57, %v131_v55 }
 0x13a   :  { %224 = vst [vmem:[#allocation5 + $0x40] sm:$0xff] %v208_v58  ;;  %225 = vst [vmem:[#allocation5 + $0x48] sm:$0xff] %v209_v59 }
 0x13b   :  { %218 = vst [vmem:[#allocation5 + $0x10] sm:$0xff] %v202_v60  ;;  %219 = vst [vmem:[#allocation5 + $0x18] sm:$0xff] %v203_v61  ;;  %v195_v2 = vpop.permute.xlu0 %194  ;;  %v180_v3 = vpop.permute.xlu1 %179 }
 0x13c   :  { %v212_v4 = vmul.f32 %v195_v2, %v140_v62  ;;  %v213_v5 = vmul.f32 %v195_v2, %v141_v63  ;;  %v206_v6 = vmul.f32 %v180_v3, %v134_v0  ;;  %v207_v7 = vmul.f32 %v180_v3, %v135_v1 }
 0x13e   :  { %228 = vst [vmem:[#allocation5 + $0x60] sm:$0xff] %v212_v4  ;;  %229 = vst [vmem:[#allocation5 + $0x68] sm:$0xff] %v213_v5 }
 0x13f   :  { %222 = vst [vmem:[#allocation5 + $0x30] sm:$0xff] %v206_v6  ;;  %223 = vst [vmem:[#allocation5 + $0x38] sm:$0xff] %v207_v7  ;;  %v191_v10 = vpop.permute.xlu1 %190 }
 0x140   :  { %v210_v11 = vmul.f32 %v191_v10, %v138_v8  ;;  %v211_v12 = vmul.f32 %v191_v10, %v139_v9 }
 0x142   :  { %226 = vst [vmem:[#allocation5 + $0x50] sm:$0xff] %v210_v11  ;;  %227 = vst [vmem:[#allocation5 + $0x58] sm:$0xff] %v211_v12 }
 0x143   :  { %v199_v15 = vpop.permute.xlu1 %198 }
 0x144   :  { %v214_v16 = vmul.f32 %v199_v15, %v142_v13  ;;  %v215_v17 = vmul.f32 %v199_v15, %v143_v14 }
 0x146   :  { %230 = vst [vmem:[#allocation5 + $0x70] sm:$0xff] %v214_v16  ;;  %231 = vst [vmem:[#allocation5 + $0x78] sm:$0xff] %v215_v17 }
 0x147   :  { %301 = shalt.err (!%p298_p12)
}
 0x148   :  { %s302_s12 = scalar_lea.hbm %s393_s4, 2048 }
 0x149   :  { %p303_p13 = scmp.ne.s32.totalorder %s393_s4, %s302_s12  ;;  %p306_p0 = scmp.lt.u32.totalorder %s302_s12, %s393_s4 }
 0x14b   :  { %p308_p1 = pnand %p306_p0, %p303_p13 }
 0x14d   :  { %311 = shalt.err (!%p308_p1)
}
 0x14e   :  { %243 = dma.vmem_to_hbm [thread:$0]  %s238_s1, 2048, %s393_s4, [#allocation4], %s317_s25, %s317_s25, %s318_s26  }
 0x14f   :  { %314 = dma.done.wait [#allocation4], 2048  }
 0x150   :  { %315 = vsyncadd [#allocation4], 4294965248 }
 0x151   :  { %247 = vsyncpa [#allocation3], 1 }
 0x152   :  { %248 = vsyncpa [#allocation4], 1 }

</bundles_post_ra>
